<compile_context>
chip_gen: v7x
topology: tpu7x:2x2x1
jax: 0.10.0
libtpu: 0.0.40
codegen_flags: <defaults>
</compile_context>

<pallas_src>
import jax
import jax.numpy as jnp
import numpy as np
from jax.experimental import pallas as pl
from jax.experimental.pallas import tpu as pltpu


def rbfnn_kernel(x_ref, ct_ref, ng_ref, wt_ref, b_ref, o_ref):
    """Fused RBF distance + gaussian activation + (tiny-O) linear head.

    x_ref  : (TN, D) f32   batch tile
    ct_ref : (D, C)  f32   centers transposed (resident in VMEM)
    ng_ref : (1, C)  f32   -0.5 * exp(-2 * log_sigmas)
    wt_ref : (O, C)  f32   linear weight, torch layout
    b_ref  : (O,)    f32   bias (SMEM)
    o_ref  : (TN, O) f32
    """
    x = x_ref[...]            # (TN, D)
    ct = ct_ref[...]          # (D, C)
    ng = ng_ref[...]          # (1, C)
    wt = wt_ref[...]          # (O, C)

    D = ct.shape[0]
    O = wt.shape[0]

    # Squared euclidean distance on the VPU, unrolled over the tiny static
    # feature dim: dist[n, c] = sum_d (x[n, d] - centers[c, d])^2
    diff0 = x[:, 0:1] - ct[0:1, :]                      # (TN, C) broadcast
    dist = diff0 * diff0
    for d in range(1, D):
        dd = x[:, d:d + 1] - ct[d:d + 1, :]
        dist = dist + dd * dd

    # Gaussian activation: one VPU mul + one EUP exp (scale pre-folded).
    rbf = jnp.exp(dist * ng)                            # (TN, C)

    # Linear head for tiny O: per-output VPU multiply + cross-lane reduce.
    cols = [
        jnp.sum(rbf * wt[o:o + 1, :], axis=-1, keepdims=True) + b_ref[o]
        for o in range(O)
    ]
    out = cols[0] if O == 1 else jnp.concatenate(cols, axis=-1)
    o_ref[...] = out.astype(o_ref.dtype)


def rbfnn_forward(x, centers, log_sigmas, w, b, *, tile_n=512):
    """x: (N, D) -> (N, O).  Batch-tiled; parameters stay resident in VMEM."""
    x = jnp.asarray(x, jnp.float32)
    N, D = x.shape
    C = centers.shape[0]
    O = w.shape[1]

    # Wrapper-side one-time parameter packing.
    cT = jnp.asarray(centers, jnp.float32).T                          # (D, C)
    neg_gamma = (-0.5 * jnp.exp(-2.0 * jnp.asarray(log_sigmas, jnp.float32))
                 ).reshape(1, C)                                      # (1, C)
    wT = jnp.asarray(w, jnp.float32).T                                # (O, C)
    b1 = jnp.asarray(b, jnp.float32).reshape(O)                       # (O,)

    tn = min(tile_n, N)
    n_pad = pl.cdiv(N, tn) * tn
    if n_pad != N:
        x = jnp.pad(x, ((0, n_pad - N), (0, 0)))
    grid = (n_pad // tn,)

    out = pl.pallas_call(
        rbfnn_kernel,
        out_shape=jax.ShapeDtypeStruct((n_pad, O), jnp.float32),
        grid=grid,
        in_specs=[
            pl.BlockSpec((tn, D), lambda i: (i, 0)),                  # x tile
            pl.BlockSpec(memory_space=pltpu.MemorySpace.VMEM),        # centers^T
            pl.BlockSpec(memory_space=pltpu.MemorySpace.VMEM),        # neg_gamma
            pl.BlockSpec(memory_space=pltpu.MemorySpace.VMEM),        # W^T
            pl.BlockSpec(memory_space=pltpu.MemorySpace.SMEM),        # bias
        ],
        out_specs=pl.BlockSpec((tn, O), lambda i: (i, 0)),
        compiler_params=pltpu.CompilerParams(
            dimension_semantics=("parallel",)),
    )(x, cT, neg_gamma, wT, b1)
    return out[:N]


def rbfnn_reference(x, centers, log_sigmas, w, b):
    """Pure-JAX transliteration of the PyTorch forward (input_dim < 3)."""
    diff = x[:, None, :] - centers[None, :, :]               # (N, C, D)
    dist = jnp.sum(diff * diff, axis=-1)                     # (N, C)
    sig = jnp.exp(log_sigmas)                                # (C,)
    rbf = jnp.exp(-dist / (2.0 * sig * sig))                 # (N, C)
    return rbf @ w + b                                       # (N, O)


if __name__ == "__main__":
    # Model hyper-params (input_dim=2 path of RBFNN).
    N, D, C, O = 256, 2, 128, 1
    TILE_N = 128   # exercises a 2-step batch grid

    key = jax.random.PRNGKey(0)
    k_x, k_c, k_w, k_b = jax.random.split(key, 4)

    # Deterministic parameter init mirroring torch defaults:
    #   centers ~ U[0, 1)          (torch.rand)
    #   log_sigmas = 0             (torch.zeros)
    #   Linear weight/bias ~ U[-1/sqrt(C), 1/sqrt(C)]
    centers = jax.random.uniform(k_c, (C, D), dtype=jnp.float32)
    log_sigmas = jnp.zeros((C,), dtype=jnp.float32)
    bound = 1.0 / np.sqrt(C)
    w = jax.random.uniform(k_w, (C, O), minval=-bound, maxval=bound,
                           dtype=jnp.float32)
    b = jax.random.uniform(k_b, (O,), minval=-bound, maxval=bound,
                           dtype=jnp.float32)

    # Example input: batch of points in R^2.
    x = jax.random.normal(k_x, (N, D), dtype=jnp.float32)

    out = rbfnn_forward(x, centers, log_sigmas, w, b, tile_n=TILE_N)
    out = jax.block_until_ready(out)

    ref = rbfnn_reference(x, centers, log_sigmas, w, b.reshape(1, -1))
    np.testing.assert_allclose(np.asarray(out), np.asarray(ref),
                               rtol=1e-4, atol=1e-5)

    print("KERNEL_OK")
</pallas_src>

<mosaic_0001>
module attributes {stable_mosaic.version = 11 : i64} {
  func.func @rbfnn_kernel(%arg0: i32, %arg1: memref<128x2xf32, #tpu.memory_space<vmem>>, %arg2: memref<2x128xf32, #tpu.memory_space<vmem>>, %arg3: memref<1x128xf32, #tpu.memory_space<vmem>>, %arg4: memref<1x128xf32, #tpu.memory_space<vmem>>, %arg5: memref<1xf32, #tpu.memory_space<smem>>, %arg6: memref<128x1xf32, #tpu.memory_space<vmem>>) attributes {dimension_semantics = [#tpu.dimension_semantics<parallel>], iteration_bounds = array<i64: 2>, scalar_prefetch = 0 : i64, scratch_operands = 0 : i64, tpu.core_type = #tpu.core_type<tc>, window_params = [{transform_indices = @transform_0, window_bounds = array<i64: 128, 2>}, {pipeline_mode = #tpu.pipeline_mode<synchronous>, transform_indices = @transform_1, window_bounds = array<i64: 2, 128>}, {pipeline_mode = #tpu.pipeline_mode<synchronous>, transform_indices = @transform_2, window_bounds = array<i64: 1, 128>}, {pipeline_mode = #tpu.pipeline_mode<synchronous>, transform_indices = @transform_3, window_bounds = array<i64: 1, 128>}, {transform_indices = @transform_4, window_bounds = array<i64: 1>}, {transform_indices = @transform_5, window_bounds = array<i64: 128, 1>}]} {
    %c0 = arith.constant 0 : index
    %c0_0 = arith.constant 0 : index
    %0 = vector.load %arg1[%c0, %c0_0] : memref<128x2xf32, #tpu.memory_space<vmem>>, vector<128x2xf32>
    %c0_1 = arith.constant 0 : index
    %c0_2 = arith.constant 0 : index
    %1 = vector.load %arg2[%c0_1, %c0_2] : memref<2x128xf32, #tpu.memory_space<vmem>>, vector<2x128xf32>
    %c0_3 = arith.constant 0 : index
    %c0_4 = arith.constant 0 : index
    %2 = vector.load %arg3[%c0_3, %c0_4] : memref<1x128xf32, #tpu.memory_space<vmem>>, vector<1x128xf32>
    %c0_5 = arith.constant 0 : index
    %c0_6 = arith.constant 0 : index
    %3 = vector.load %arg4[%c0_5, %c0_6] : memref<1x128xf32, #tpu.memory_space<vmem>>, vector<1x128xf32>
    %4 = vector.extract_strided_slice %0 {offsets = [0, 0], sizes = [128, 1], strides = [1, 1]} : vector<128x2xf32> to vector<128x1xf32>
    %5 = vector.extract_strided_slice %1 {offsets = [0, 0], sizes = [1, 128], strides = [1, 1]} : vector<2x128xf32> to vector<1x128xf32>
    %6 = vector.broadcast %4 : vector<128x1xf32> to vector<128x128xf32>
    %7 = vector.broadcast %5 : vector<1x128xf32> to vector<128x128xf32>
    %8 = arith.subf %6, %7 : vector<128x128xf32>
    %9 = arith.mulf %8, %8 : vector<128x128xf32>
    %10 = vector.extract_strided_slice %0 {offsets = [0, 1], sizes = [128, 1], strides = [1, 1]} : vector<128x2xf32> to vector<128x1xf32>
    %11 = vector.extract_strided_slice %1 {offsets = [1, 0], sizes = [1, 128], strides = [1, 1]} : vector<2x128xf32> to vector<1x128xf32>
    %12 = vector.broadcast %10 : vector<128x1xf32> to vector<128x128xf32>
    %13 = vector.broadcast %11 : vector<1x128xf32> to vector<128x128xf32>
    %14 = arith.subf %12, %13 : vector<128x128xf32>
    %15 = arith.mulf %14, %14 : vector<128x128xf32>
    %16 = arith.addf %9, %15 : vector<128x128xf32>
    %17 = vector.broadcast %2 : vector<1x128xf32> to vector<128x128xf32>
    %18 = arith.mulf %16, %17 : vector<128x128xf32>
    %19 = math.exp %18 : vector<128x128xf32>
    %20 = vector.broadcast %3 : vector<1x128xf32> to vector<128x128xf32>
    %21 = arith.mulf %19, %20 : vector<128x128xf32>
    %cst = arith.constant dense<0.000000e+00> : vector<128xf32>
    %22 = vector.multi_reduction <add>, %21, %cst [1] : vector<128x128xf32> to vector<128xf32>
    %23 = vector.shape_cast %22 : vector<128xf32> to vector<128x1xf32>
    %c0_7 = arith.constant 0 : index
    %24 = memref.load %arg5[%c0_7] : memref<1xf32, #tpu.memory_space<smem>>
    %25 = vector.broadcast %24 : f32 to vector<128x1xf32>
    %26 = arith.addf %23, %25 : vector<128x1xf32>
    %c0_8 = arith.constant 0 : index
    %c0_9 = arith.constant 0 : index
    %27 = vector.load %arg6[%c0_8, %c0_9] : memref<128x1xf32, #tpu.memory_space<vmem>>, vector<128x1xf32>
    tpu.vector_store %arg6[%c0_8, %c0_9], %26 {strides = array<i32>} : memref<128x1xf32, #tpu.memory_space<vmem>>, vector<128x1xf32>,
    return
  }
  func.func @transform_0(%arg0: i32) -> (i32, i32) {
    %c0_i32 = arith.constant 0 : i32
    %c0_i32_0 = arith.constant 0 : i32
    return %arg0, %c0_i32 : i32, i32
  }
  func.func @transform_1(%arg0: i32) -> (i32, i32) {
    %c0_i32 = arith.constant 0 : i32
    %c0_i32_0 = arith.constant 0 : i32
    %c0_i32_1 = arith.constant 0 : i32
    return %c0_i32, %c0_i32_0 : i32, i32
  }
  func.func @transform_2(%arg0: i32) -> (i32, i32) {
    %c0_i32 = arith.constant 0 : i32
    %c0_i32_0 = arith.constant 0 : i32
    %c0_i32_1 = arith.constant 0 : i32
    return %c0_i32, %c0_i32_0 : i32, i32
  }
  func.func @transform_3(%arg0: i32) -> (i32, i32) {
    %c0_i32 = arith.constant 0 : i32
    %c0_i32_0 = arith.constant 0 : i32
    %c0_i32_1 = arith.constant 0 : i32
    return %c0_i32, %c0_i32_0 : i32, i32
  }
  func.func @transform_4(%arg0: i32) -> i32 {
    %c0_i32 = arith.constant 0 : i32
    %c0_i32_0 = arith.constant 0 : i32
    return %c0_i32 : i32
  }
  func.func @transform_5(%arg0: i32) -> (i32, i32) {
    %c0_i32 = arith.constant 0 : i32
    %c0_i32_0 = arith.constant 0 : i32
    return %arg0, %c0_i32 : i32, i32
  }
}

</mosaic_0001>

<bundles_post_ra>
// kernel: tpu_custom_call.1
= control target key start
LH: loop header
LB: loop body
LE: loop exit
PB: predicated region body
PF: predicated region fallthrough
CT: control target
= control target key end

     0   :  { %s781_s20 = smov 0   ;;  %s938_s0 = inlined_call_operand.vmem [shape: f32[256,2], index: 0, kind: input, shape index: {}]   ;;  %s939_s1 = inlined_call_operand.vmem [shape: f32[2,128], index: 1, kind: input, shape index: {}]   ;;  %s940_s2 = inlined_call_operand.vmem [shape: f32[1,128], index: 2, kind: input, shape index: {}]   ;;  %s941_s3 = inlined_call_operand.vmem [shape: f32[1,128], index: 3, kind: input, shape index: {}]   ;;  %s942_s4 = inlined_call_operand.<no memory space> [shape: f32[1], index: 4, kind: input, shape index: {}]   ;;  %s943_s5 = inlined_call_operand.vmem [shape: f32[256,1], index: 5, kind: output, shape index: {}]  }
   0x1   :  { %10 = sst [smem:[#allocation2]] %s942_s4 }
   0x2 LB: > { %s679_s21 = sadd.s32 4294967295, %s744_s20   ;;  %p683_p0 = scmp.ge.s32.totalorder %s744_s20, 1  ;;  %s744_s20 = sphi %s781_s20, %s16_s20  }
   0x3   : > { %p189_p1 = scmp.lt.s32.totalorder %s744_s20, 3 }
   0x5   : > { %p190_p2 = pnand %p683_p0, %p189_p1 }
   0x6   : > { %s684_s22 = sshll.u32 (!%p190_p2), %s679_s21, 4  ;;  %v746_v0 = vmov (!%p190_p2), 0   ;;  %v747_v17 = vmov (!%p190_p2), 1   ;;  %v328_v26 = vlaneseq (!%p190_p2)  ;;  %v245_v35 = vld [vmem:[%s939_s1] sm:$0x3] (!%p190_p2)  ;;  %s588_s7 = sld [smem:[#allocation2]] (!%p190_p2) }
   0x7   : > { %193 = sbr.rel (%p190_p2) target bundleno = 377 (0x179), region = 40  ;;  %703 = vset.pattern.permute.xlu1 (!%p190_p2), %v746_v0  ;;  %702 = vset.pattern.permute.xlu0 (!%p190_p2), %v746_v0  ;;  %p218_p3 = scmp.lt.s32.totalorder (!%p190_p2), %s684_s22, 31  ;;  %v827_v55 = vld [vmem:[%s940_s2] ss:$0 sm:$0xff] (!%p190_p2)  ;;  %vm606_vm0 = vcmask (!%p190_p2), 7168  }
   0x8   : > { %v329_v29 = vshrl.u32 (!%p190_p2), %v328_v26, 7 }
   0xa   : > { %v330_v32 = vsub.s32 (!%p190_p2), 0, %v329_v29  ;;  %v430_v36 = vsub.s32 (!%p190_p2), 1, %v329_v29 }
   0xc   : > { %v808_v37 = vrot.slane (!%p190_p2), %v245_v35, %v330_v32  ;;  %v814_v40 = vrot.slane (!%p190_p2), %v245_v35, %v430_v36 }
   0xe   : > { %s945_s22 = smov (!%p218_p3, %s684_s22), 31 }
   0xf   : > { %s685_s4 = sshll.u32 %s945_s22, 3 }
  0x10   : > { %s221_s25 = scalar_lea.vmem %s938_s0, %s685_s4  ;;  %s901_s10 = scalar_lea.vmem %s943_s5, %s685_s4 }
  0x11   : > { %v231_v1 = vld [vmem:[%s221_s25 + $0x10] sm:$0xff]  ;;  %v229_v2 = vld [vmem:[%s221_s25] sm:$0xff]  ;;  %v232_v3 = vld [vmem:[%s221_s25 + $0x18] sm:$0xff] }
  0x12   : > { %260 = vperm.xlu1 %703, %v231_v1   ;;  %250 = vperm.xlu0 %702, %v229_v2   ;;  %v230_v4 = vld [vmem:[%s221_s25 + $0x8] sm:$0xff]  ;;  %v233_v6 = vld [vmem:[%s221_s25 + $0x20] sm:$0xff]  ;;  %v236_v7 = vld [vmem:[%s221_s25 + $0x38] sm:$0xff] }
  0x13   : > { %v234_v5 = vld [vmem:[%s221_s25 + $0x28] sm:$0xff]  ;;  %v235_v8 = vld [vmem:[%s221_s25 + $0x30] sm:$0xff]  ;;  %v237_v10 = vld [vmem:[%s221_s25 + $0x40] sm:$0xff] }
  0x14   : > { %v238_v9 = vld [vmem:[%s221_s25 + $0x48] sm:$0xff]  ;;  %v240_v11 = vld [vmem:[%s221_s25 + $0x58] sm:$0xff]  ;;  %v239_v12 = vld [vmem:[%s221_s25 + $0x50] sm:$0xff] }
  0x15   : > { %v242_v13 = vld [vmem:[%s221_s25 + $0x68] sm:$0xff]  ;;  %v241_v14 = vld [vmem:[%s221_s25 + $0x60] sm:$0xff]  ;;  %v244_v15 = vld [vmem:[%s221_s25 + $0x78] sm:$0xff] }
  0x16   : > { %265 = vperm.xlu1 %703, %v232_v3   ;;  %255 = vperm.xlu0 %702, %v230_v4   ;;  %v243_v16 = vld [vmem:[%s221_s25 + $0x70] sm:$0xff] }
  0x1a   : > { %275 = vperm.xlu1 %703, %v234_v5   ;;  %270 = vperm.xlu0 %702, %v233_v6  }
  0x1e   : > { %285 = vperm.xlu1 %703, %v236_v7   ;;  %280 = vperm.xlu0 %702, %v235_v8  }
  0x22   : > { %295 = vperm.xlu1 %703, %v238_v9   ;;  %290 = vperm.xlu0 %702, %v237_v10  }
  0x26   : > { %305 = vperm.xlu1 %703, %v240_v11   ;;  %300 = vperm.xlu0 %702, %v239_v12  }
  0x2a   : > { %315 = vperm.xlu1 %703, %v242_v13   ;;  %310 = vperm.xlu0 %702, %v241_v14  }
  0x2e   : > { %325 = vperm.xlu1 %703, %v244_v15   ;;  %320 = vperm.xlu0 %702, %v243_v16  }
  0x32   : > { %705 = vset.pattern.permute.xlu1 %v747_v17  ;;  %704 = vset.pattern.permute.xlu0 %v747_v17 }
  0x33   : > { %369 = vperm.xlu1 %705, %v230_v4   ;;  %365 = vperm.xlu0 %704, %v229_v2  }
  0x37   : > { %373 = vperm.xlu1 %705, %v231_v1   ;;  %377 = vperm.xlu0 %704, %v232_v3  }
  0x3b   : > { %381 = vperm.xlu1 %705, %v233_v6   ;;  %385 = vperm.xlu0 %704, %v234_v5  }
  0x3f   : > { %389 = vperm.xlu1 %705, %v235_v8   ;;  %393 = vperm.xlu0 %704, %v236_v7  }
  0x43   : > { %397 = vperm.xlu1 %705, %v237_v10   ;;  %401 = vperm.xlu0 %704, %v238_v9  }
  0x47   : > { %405 = vperm.xlu1 %705, %v239_v12   ;;  %409 = vperm.xlu0 %704, %v240_v11  }
  0x4b   : > { %413 = vperm.xlu1 %705, %v241_v14   ;;  %417 = vperm.xlu0 %704, %v242_v13  }
  0x4f   : > { %421 = vperm.xlu1 %705, %v243_v16   ;;  %425 = vperm.xlu0 %704, %v244_v15  }
  0x91   : > { %v261_v18 = vpop.permute.xlu1 %260  ;;  %v251_v19 = vpop.permute.xlu0 %250 }
  0x92   : > { %v332_v41 = vsub.f32 %v251_v19, %v808_v37  ;;  %v334_v47 = vsub.f32 %v261_v18, %v808_v37 }
  0x94   : > { %v348_v49 = vmul.f32 %v332_v41, %v332_v41  ;;  %v350_v62 = vmul.f32 %v334_v47, %v334_v47 }
  0x95   : > { %v266_v20 = vpop.permute.xlu1 %265  ;;  %v256_v21 = vpop.permute.xlu0 %255 }
  0x96   : > { %v333_v42 = vsub.f32 %v256_v21, %v808_v37  ;;  %v335_v48 = vsub.f32 %v266_v20, %v808_v37 }
  0x98   : > { %v349_v50 = vmul.f32 %v333_v42, %v333_v42  ;;  %v351_v63 = vmul.f32 %v335_v48, %v335_v48 }
  0x99   : > { %v276_v22 = vpop.permute.xlu1 %275  ;;  %v271_v23 = vpop.permute.xlu0 %270 }
  0x9a   : > { %v337_v53 = vsub.f32 %v276_v22, %v808_v37  ;;  %v336_v54 = vsub.f32 %v271_v23, %v808_v37 }
  0x9c   : > { %v353_v6 = vmul.f32 %v337_v53, %v337_v53  ;;  %v352_v7 = vmul.f32 %v336_v54, %v336_v54 }
  0x9d   : > { %v286_v24 = vpop.permute.xlu1 %285  ;;  %v281_v25 = vpop.permute.xlu0 %280 }
  0x9e   : > { %v339_v0 = vsub.f32 %v286_v24, %v808_v37  ;;  %v338_v1 = vsub.f32 %v281_v25, %v808_v37 }
  0xa0   : > { %v355_v14 = vmul.f32 %v339_v0, %v339_v0  ;;  %v354_v18 = vmul.f32 %v338_v1, %v338_v1 }
  0xa1   : > { %v296_v27 = vpop.permute.xlu1 %295  ;;  %v291_v28 = vpop.permute.xlu0 %290 }
  0xa2   : > { %v341_v15 = vsub.f32 %v296_v27, %v808_v37  ;;  %v340_v21 = vsub.f32 %v291_v28, %v808_v37 }
  0xa4   : > { %v357_v35 = vmul.f32 %v341_v15, %v341_v15 }
  0xa5   : > { %v797_v30 = vpop.permute.xlu1 %305  ;;  %v799_v31 = vpop.permute.xlu0 %300 }
  0xa6   : > { %v343_v36 = vsub.f32 %v797_v30, %v808_v37  ;;  %v342_v28 = vsub.f32 %v799_v31, %v808_v37  ;;  %v356_v31 = vmul.f32 %v340_v21, %v340_v21 }
  0xa9   : > { %v801_v33 = vpop.permute.xlu1 %315  ;;  %v803_v34 = vpop.permute.xlu0 %310 }
  0xaa   : > { %v344_v53 = vsub.f32 %v803_v34, %v808_v37 }
  0xad   : > { %v810_v38 = vpop.permute.xlu1 %325  ;;  %v812_v39 = vpop.permute.xlu0 %320 }
  0xb2   : > { %v370_v43 = vpop.permute.xlu1 %369  ;;  %v366_v44 = vpop.permute.xlu0 %365 }
  0xb3   : > { %v433_v45 = vsub.f32 %v370_v43, %v814_v40  ;;  %v432_v46 = vsub.f32 %v366_v44, %v814_v40 }
  0xb5   : > { %v449_v51 = vmul.f32 %v433_v45, %v433_v45  ;;  %v448_v52 = vmul.f32 %v432_v46, %v432_v46  ;;  %v345_v45 = vsub.f32 %v801_v33, %v808_v37 }
  0xb6   : > { %v374_v56 = vpop.permute.xlu1 %373  ;;  %v378_v57 = vpop.permute.xlu0 %377 }
  0xb7   : > { %v465_v58 = vadd.f32 %v449_v51, %v349_v50  ;;  %v464_v59 = vadd.f32 %v448_v52, %v348_v49  ;;  %v434_v60 = vsub.f32 %v374_v56, %v814_v40  ;;  %v435_v61 = vsub.f32 %v378_v57, %v814_v40 }
  0xb9   : > { %v487_v2 = vmul.f32 %v827_v55, %v465_v58  ;;  %v486_v3 = vmul.f32 %v827_v55, %v464_v59  ;;  %v450_v4 = vmul.f32 %v434_v60, %v434_v60  ;;  %v451_v5 = vmul.f32 %v435_v61, %v435_v61  ;;  %v860_v60 = vld [vmem:[%s941_s3] ss:$0 sm:$0xff] }
  0xba   : > { %v382_v8 = vpop.permute.xlu1 %381  ;;  %v386_v9 = vpop.permute.xlu0 %385  ;;  %v359_v61 = vmul.f32 %v343_v36, %v343_v36 }
  0xbb   : > { %v504_v10 = vmul.f32 1.442695, %v487_v2  ;;  %v502_v11 = vmul.f32 1.442695, %v486_v3  ;;  %v466_v12 = vadd.f32 %v450_v4, %v350_v62  ;;  %v467_v13 = vadd.f32 %v451_v5, %v351_v63 }
  0xbc   : > { %v436_v16 = vsub.f32 %v382_v8, %v814_v40  ;;  %v437_v17 = vsub.f32 %v386_v9, %v814_v40  ;;  %v358_v62 = vmul.f32 %v342_v28, %v342_v28  ;;  %v361_v63 = vmul.f32 %v345_v45, %v345_v45 }
  0xbd   : > { %706 = vpow2.f32 %v504_v10  ;;  %v488_v19 = vmul.f32 %v827_v55, %v466_v12  ;;  %v489_v20 = vmul.f32 %v827_v55, %v467_v13  ;;  %v360_v10 = vmul.f32 %v344_v53, %v344_v53 }
  0xbe   : > { %708 = vpow2.f32 %v502_v11  ;;  %v452_v22 = vmul.f32 %v436_v16, %v436_v16  ;;  %v453_v23 = vmul.f32 %v437_v17, %v437_v17  ;;  %v390_v24 = vpop.permute.xlu1 %389  ;;  %v394_v25 = vpop.permute.xlu0 %393 }
  0xbf   : > { %v506_v26 = vmul.f32 1.442695, %v488_v19  ;;  %v508_v29 = vmul.f32 1.442695, %v489_v20  ;;  %v438_v27 = vsub.f32 %v390_v24, %v814_v40  ;;  %v439_v32 = vsub.f32 %v394_v25, %v814_v40 }
  0xc0   : > { %v468_v41 = vadd.f32 %v452_v22, %v352_v7  ;;  %v469_v42 = vadd.f32 %v453_v23, %v353_v6  ;;  %v346_v19 = vsub.f32 %v812_v39, %v808_v37  ;;  %v347_v39 = vsub.f32 %v810_v38, %v808_v37 }
  0xc1   : > { %710 = vpow2.f32 %v506_v26  ;;  %v454_v43 = vmul.f32 %v438_v27, %v438_v27  ;;  %v455_v44 = vmul.f32 %v439_v32, %v439_v32 }
  0xc2   : > { %712 = vpow2.f32 %v508_v29  ;;  %v490_v46 = vmul.f32 %v827_v55, %v468_v41  ;;  %v491_v47 = vmul.f32 %v827_v55, %v469_v42  ;;  %v398_v48 = vpop.permute.xlu1 %397  ;;  %v402_v49 = vpop.permute.xlu0 %401 }
  0xc3   : > { %v470_v50 = vadd.f32 %v454_v43, %v354_v18  ;;  %v471_v30 = vadd.f32 %v455_v44, %v355_v14  ;;  %v440_v51 = vsub.f32 %v398_v48, %v814_v40  ;;  %v441_v52 = vsub.f32 %v402_v49, %v814_v40 }
  0xc4   : > { %v510_v54 = vmul.f32 1.442695, %v490_v46  ;;  %v512_v56 = vmul.f32 1.442695, %v491_v47  ;;  %v362_v48 = vmul.f32 %v346_v19, %v346_v19 }
  0xc5   : > { %v492_v33 = vmul.f32 %v827_v55, %v470_v50  ;;  %v493_v57 = vmul.f32 %v827_v55, %v471_v30  ;;  %v456_v58 = vmul.f32 %v440_v51, %v440_v51  ;;  %v457_v59 = vmul.f32 %v441_v52, %v441_v52 }
  0xc6   : > { %714 = vpow2.f32 %v510_v54  ;;  %v406_v0 = vpop.permute.xlu1 %405  ;;  %v410_v1 = vpop.permute.xlu0 %409 }
  0xc7   : > { %v707_v34 = vpop.eup %706  ;;  %716 = vpow2.f32 %v512_v56  ;;  %v514_v2 = vmul.f32 1.442695, %v492_v33  ;;  %v516_v3 = vmul.f32 1.442695, %v493_v57  ;;  %v472_v4 = vadd.f32 %v456_v58, %v356_v31 }
  0xc8   : > { %v709_v5 = vpop.eup %708  ;;  %v473_v6 = vadd.f32 %v457_v59, %v357_v35  ;;  %v442_v7 = vsub.f32 %v406_v0, %v814_v40  ;;  %v443_v8 = vsub.f32 %v410_v1, %v814_v40  ;;  %v541_v9 = vmul.f32 %v707_v34, %v860_v60 }
  0xc9   : > { %718 = vpow2.f32 %v514_v2  ;;  %v494_v11 = vmul.f32 %v827_v55, %v472_v4  ;;  %v540_v12 = vmul.f32 %v709_v5, %v860_v60  ;;  %v363_v31 = vmul.f32 %v347_v39, %v347_v39 }
  0xca   : > { %720 = vpow2.f32 %v516_v3  ;;  %v495_v13 = vmul.f32 %v827_v55, %v473_v6  ;;  %v458_v14 = vmul.f32 %v442_v7, %v442_v7  ;;  %v459_v15 = vmul.f32 %v443_v8, %v443_v8  ;;  %v414_v16 = vpop.permute.xlu1 %413  ;;  %558 = vadd.xlane.f32.xlu0 %v541_v9  ;;  %v418_v17 = vpop.permute.xlu0 %417 }
  0xcb   : > { %v711_v18 = vpop.eup %710  ;;  %v518_v20 = vmul.f32 1.442695, %v494_v11  ;;  %v444_v21 = vsub.f32 %v414_v16, %v814_v40  ;;  %556 = vadd.xlane.f32.xlu1 %v540_v12  ;;  %v445_v22 = vsub.f32 %v418_v17, %v814_v40  ;;  %v589_v17 = vstv %s588_s7 }
  0xcc   : > { %v713_v23 = vpop.eup %712  ;;  %v520_v24 = vmul.f32 1.442695, %v495_v13  ;;  %v474_v25 = vadd.f32 %v458_v14, %v358_v62  ;;  %v475_v26 = vadd.f32 %v459_v15, %v359_v61  ;;  %v542_v29 = vmul.f32 %v711_v18, %v860_v60 }
  0xcd   : > { %722 = vpow2.f32 %v518_v20  ;;  %v460_v27 = vmul.f32 %v444_v21, %v444_v21  ;;  %v461_v32 = vmul.f32 %v445_v22, %v445_v22  ;;  %v543_v35 = vmul.f32 %v713_v23, %v860_v60 }
  0xce   : > { %724 = vpow2.f32 %v520_v24  ;;  %v496_v36 = vmul.f32 %v827_v55, %v474_v25  ;;  %v497_v41 = vmul.f32 %v827_v55, %v475_v26  ;;  %v422_v42 = vpop.permute.xlu1 %421  ;;  %560 = vadd.xlane.f32.xlu0 %v542_v29  ;;  %v426_v28 = vpop.permute.xlu0 %425 }
  0xcf   : > { %v476_v43 = vadd.f32 %v460_v27, %v360_v10  ;;  %v477_v44 = vadd.f32 %v461_v32, %v361_v63  ;;  %v446_v45 = vsub.f32 %v422_v42, %v814_v40  ;;  %562 = vadd.xlane.f32.xlu1 %v543_v35  ;;  %v447_v46 = vsub.f32 %v426_v28, %v814_v40 }
  0xd0   : > { %v715_v47 = vpop.eup %714  ;;  %v522_v49 = vmul.f32 1.442695, %v496_v36  ;;  %v524_v50 = vmul.f32 1.442695, %v497_v41 }
  0xd1   : > { %v717_v37 = vpop.eup %716  ;;  %v498_v38 = vmul.f32 %v827_v55, %v476_v43  ;;  %v499_v30 = vmul.f32 %v827_v55, %v477_v44  ;;  %v462_v51 = vmul.f32 %v446_v45, %v446_v45  ;;  %v463_v52 = vmul.f32 %v447_v46, %v447_v46 }
  0xd2   : > { %726 = vpow2.f32 %v522_v49  ;;  %v544_v53 = vmul.f32 %v715_v47, %v860_v60  ;;  %v545_v54 = vmul.f32 %v717_v37, %v860_v60 }
  0xd3   : > { %v719_v56 = vpop.eup %718  ;;  %728 = vpow2.f32 %v524_v50  ;;  %v526_v40 = vmul.f32 1.442695, %v498_v38  ;;  %v528_v33 = vmul.f32 1.442695, %v499_v30  ;;  %v478_v57 = vadd.f32 %v462_v51, %v362_v48 }
  0xd4   : > { %v721_v58 = vpop.eup %720  ;;  %v479_v59 = vadd.f32 %v463_v52, %v363_v31  ;;  %564 = vadd.xlane.f32.xlu0 %v544_v53  ;;  %566 = vadd.xlane.f32.xlu1 %v545_v54  ;;  %v546_v61 = vmul.f32 %v719_v56, %v860_v60 }
  0xd5   : > { %730 = vpow2.f32 %v526_v40  ;;  %v500_v62 = vmul.f32 %v827_v55, %v478_v57  ;;  %v547_v63 = vmul.f32 %v721_v58, %v860_v60 }
  0xd6   : > { %732 = vpow2.f32 %v528_v33  ;;  %v501_v0 = vmul.f32 %v827_v55, %v479_v59 }
  0xd7   : > { %v723_v1 = vpop.eup %722  ;;  %v530_v34 = vmul.f32 1.442695, %v500_v62 }
  0xd8   : > { %v725_v2 = vpop.eup %724  ;;  %v532_v3 = vmul.f32 1.442695, %v501_v0  ;;  %568 = vadd.xlane.f32.xlu0 %v546_v61  ;;  %570 = vadd.xlane.f32.xlu1 %v547_v63  ;;  %v548_v4 = vmul.f32 %v723_v1, %v860_v60 }
  0xd9   : > { %734 = vpow2.f32 %v530_v34  ;;  %v549_v5 = vmul.f32 %v725_v2, %v860_v60 }
  0xda   : > { %736 = vpow2.f32 %v532_v3 }
  0xdc   : > { %v727_v6 = vpop.eup %726  ;;  %572 = vadd.xlane.f32.xlu0 %v548_v4  ;;  %574 = vadd.xlane.f32.xlu1 %v549_v5 }
  0xdd   : > { %v729_v7 = vpop.eup %728  ;;  %v550_v8 = vmul.f32 %v727_v6, %v860_v60 }
  0xde   : > { %v551_v55 = vmul.f32 %v729_v7, %v860_v60 }
  0xdf   : > { %v731_v9 = vpop.eup %730 }
  0xe0   : > { %v733_v10 = vpop.eup %732  ;;  %576 = vadd.xlane.f32.xlu0 %v550_v8  ;;  %578 = vadd.xlane.f32.xlu1 %v551_v55  ;;  %v552_v11 = vmul.f32 %v731_v9, %v860_v60 }
  0xe1   : > { %v553_v12 = vmul.f32 %v733_v10, %v860_v60 }
  0xe3   : > { %v735_v13 = vpop.eup %734 }
  0xe4   : > { %v737_v14 = vpop.eup %736  ;;  %580 = vadd.xlane.f32.xlu0 %v552_v11  ;;  %582 = vadd.xlane.f32.xlu1 %v553_v12  ;;  %v554_v15 = vmul.f32 %v735_v13, %v860_v60 }
  0xe5   : > { %v555_v16 = vmul.f32 %v737_v14, %v860_v60 }
  0xe8   : > { %584 = vadd.xlane.f32.xlu0 %v554_v15  ;;  %586 = vadd.xlane.f32.xlu1 %v555_v16 }
 0x157   : > { %v559_v18 = vpop.xlane.xlu0 %558 }
 0x158   : > { %v557_v19 = vpop.xlane.xlu1 %556  ;;  %v591_v60 = vadd.f32 %v589_v17, %v559_v18 }
 0x159   : > { %v590_v20 = vadd.f32 %v589_v17, %v557_v19 }
 0x15a   : > { %608 = vst.msk [vmem:[%s901_s10 + $0x8] sm:$0xff] %vm606_vm0, %v591_v60 }
 0x15b   : > { %607 = vst.msk [vmem:[%s901_s10] sm:$0xff] %vm606_vm0, %v590_v20  ;;  %v561_v21 = vpop.xlane.xlu0 %560 }
 0x15c   : > { %v563_v22 = vpop.xlane.xlu1 %562  ;;  %v592_v23 = vadd.f32 %v589_v17, %v561_v21 }
 0x15d   : > { %v593_v24 = vadd.f32 %v589_v17, %v563_v22 }
 0x15e   : > { %609 = vst.msk [vmem:[%s901_s10 + $0x10] sm:$0xff] %vm606_vm0, %v592_v23 }
 0x15f   : > { %610 = vst.msk [vmem:[%s901_s10 + $0x18] sm:$0xff] %vm606_vm0, %v593_v24 }
 0x161   : > { %v567_v25 = vpop.xlane.xlu1 %566  ;;  %v565_v26 = vpop.xlane.xlu0 %564 }
 0x162   : > { %v595_v29 = vadd.f32 %v589_v17, %v567_v25  ;;  %v594_v27 = vadd.f32 %v589_v17, %v565_v26 }
 0x164   : > { %612 = vst.msk [vmem:[%s901_s10 + $0x28] sm:$0xff] %vm606_vm0, %v595_v29  ;;  %611 = vst.msk [vmem:[%s901_s10 + $0x20] sm:$0xff] %vm606_vm0, %v594_v27 }
 0x165   : > { %v571_v32 = vpop.xlane.xlu1 %570  ;;  %v569_v35 = vpop.xlane.xlu0 %568 }
 0x166   : > { %v597_v39 = vadd.f32 %v589_v17, %v571_v32  ;;  %v596_v36 = vadd.f32 %v589_v17, %v569_v35 }
 0x168   : > { %614 = vst.msk [vmem:[%s901_s10 + $0x38] sm:$0xff] %vm606_vm0, %v597_v39  ;;  %613 = vst.msk [vmem:[%s901_s10 + $0x30] sm:$0xff] %vm606_vm0, %v596_v36 }
 0x169   : > { %v575_v41 = vpop.xlane.xlu1 %574  ;;  %v573_v42 = vpop.xlane.xlu0 %572 }
 0x16a   : > { %v599_v28 = vadd.f32 %v589_v17, %v575_v41  ;;  %v598_v43 = vadd.f32 %v589_v17, %v573_v42 }
 0x16c   : > { %616 = vst.msk [vmem:[%s901_s10 + $0x48] sm:$0xff] %vm606_vm0, %v599_v28  ;;  %615 = vst.msk [vmem:[%s901_s10 + $0x40] sm:$0xff] %vm606_vm0, %v598_v43 }
 0x16d   : > { %v579_v44 = vpop.xlane.xlu1 %578  ;;  %v577_v45 = vpop.xlane.xlu0 %576 }
 0x16e   : > { %v601_v46 = vadd.f32 %v589_v17, %v579_v44  ;;  %v600_v47 = vadd.f32 %v589_v17, %v577_v45 }
 0x170   : > { %618 = vst.msk [vmem:[%s901_s10 + $0x58] sm:$0xff] %vm606_vm0, %v601_v46  ;;  %617 = vst.msk [vmem:[%s901_s10 + $0x50] sm:$0xff] %vm606_vm0, %v600_v47 }
 0x171   : > { %v583_v48 = vpop.xlane.xlu1 %582  ;;  %v581_v49 = vpop.xlane.xlu0 %580 }
 0x172   : > { %v603_v50 = vadd.f32 %v589_v17, %v583_v48  ;;  %v602_v37 = vadd.f32 %v589_v17, %v581_v49 }
 0x174   : > { %620 = vst.msk [vmem:[%s901_s10 + $0x68] sm:$0xff] %vm606_vm0, %v603_v50  ;;  %619 = vst.msk [vmem:[%s901_s10 + $0x60] sm:$0xff] %vm606_vm0, %v602_v37 }
 0x175   : > { %v587_v38 = vpop.xlane.xlu1 %586  ;;  %v585_v30 = vpop.xlane.xlu0 %584 }
 0x176   : > { %v605_v51 = vadd.f32 %v589_v17, %v587_v38  ;;  %v604_v52 = vadd.f32 %v589_v17, %v585_v30 }
 0x178   : > { %622 = vst.msk [vmem:[%s901_s10 + $0x78] sm:$0xff] %vm606_vm0, %v605_v51  ;;  %621 = vst.msk [vmem:[%s901_s10 + $0x70] sm:$0xff] %vm606_vm0, %v604_v52 }
 0x179 PF: > { %s16_s20 = sadd.s32 1, %s744_s20  }
 0x17a   : > { %p13_p4 = scmp.ge.s32.totalorder %s16_s20, 4  }
 0x17c   :  { %15 = sbr.rel (!%p13_p4) target bundleno = 2 (0x2), region = 70 }

</bundles_post_ra>
